<compile_context>
chip_gen: v7x
topology: tpu7x:2x2x1
jax: 0.10.0
libtpu: 0.0.40
codegen_flags: <defaults>
</compile_context>

<pallas_src>
import jax
import jax.numpy as jnp
from jax.experimental import pallas as pl
from jax.experimental.pallas import tpu as pltpu

LANES = 128
SUBLANES = 8
MAX_TILE_ROWS = 2048        # 2048 * 128 * 4 B = 1 MiB per tile
SMALL_N_THRESHOLD = 8192    # below this, fixed kernel-call overhead dominates


def mlp_kernel(w1_ref, b1_ref, w2_ref, b2_ref, x_ref, o_ref):
    """fc2(relu(fc1(x))) for in=1, hidden=5, out=1, fully unrolled on the VPU.

    w1/b1/w2 are (5,) and b2 is (1,) f32 scalars in SMEM; x/o are lane-dense
    (tile_rows, 128) f32 tiles in VMEM.
    """
    x = x_ref[...]
    acc = jnp.full_like(x, b2_ref[0])            # b2 splat init: saves one add
    for j in range(5):                           # short fixed trip count: unrolled
        acc = acc + w2_ref[j] * jnp.maximum(w1_ref[j] * x + b1_ref[j], 0.0)
    o_ref[...] = acc


def _choose_tile_rows(rows: int) -> int:
    """Multiple-of-8 tile; ~rows/2 (>=2 grid steps for v7x's 2 TCs), capped at 1 MiB."""
    if rows <= SUBLANES:
        return rows                               # single block == full array dim
    half = -(-rows // 2)                          # cdiv(rows, 2)
    tile = ((half + SUBLANES - 1) // SUBLANES) * SUBLANES
    return min(MAX_TILE_ROWS, tile)


def net_forward(x, w1, b1, w2, b2, *, force_pallas: bool = False):
    """x: (N, 1) f32; PyTorch layout w1 (5,1), b1 (5,), w2 (1,5), b2 (1,)."""
    n = x.shape[0]
    flat = x.reshape(-1).astype(jnp.float32)      # in_features == 1 -> (N,), free
    w1f = w1.reshape(5).astype(jnp.float32)
    b1f = b1.reshape(5).astype(jnp.float32)
    w2f = w2.reshape(5).astype(jnp.float32)
    b2f = b2.reshape(1).astype(jnp.float32)

    if n < SMALL_N_THRESHOLD and not force_pallas:
        # Tiny batches: let XLA fuse a single elementwise expression instead of
        # paying pallas_call / grid fixed overhead.
        return (jnp.maximum(flat[:, None] * w1f + b1f, 0.0) @ w2f + b2f[0])[:, None]

    # Lane-dense (rows, 128) layout.  Zero-copy reshape when N % 128 == 0;
    # otherwise pad only the tail of the final 128-lane row.
    rows = pl.cdiv(n, LANES)
    padded = rows * LANES
    if padded == n:
        xp = flat.reshape(rows, LANES)
    else:
        xp = jnp.pad(flat, (0, padded - n)).reshape(rows, LANES)

    tile_rows = _choose_tile_rows(rows)
    grid = pl.cdiv(rows, tile_rows)               # partial final block is fine

    smem_spec = pl.BlockSpec(memory_space=pltpu.MemorySpace.SMEM)
    out = pl.pallas_call(
        mlp_kernel,
        out_shape=jax.ShapeDtypeStruct((rows, LANES), jnp.float32),
        grid_spec=pltpu.PrefetchScalarGridSpec(
            num_scalar_prefetch=0,
            grid=(grid,),
            in_specs=[
                smem_spec,  # w1 (5,)
                smem_spec,  # b1 (5,)
                smem_spec,  # w2 (5,)
                smem_spec,  # b2 (1,)
                pl.BlockSpec((tile_rows, LANES), lambda i: (i, 0)),
            ],
            out_specs=pl.BlockSpec((tile_rows, LANES), lambda i: (i, 0)),
        ),
        compiler_params=pltpu.CompilerParams(
            dimension_semantics=("parallel",),    # shard tiles across TCs on v7x
        ),
    )(w1f, b1f, w2f, b2f, xp)

    out = out.reshape(-1)
    if padded != n:
        out = out[:n]                             # drop padded tail (garbage lanes)
    return out.reshape(n, 1)


def init_params():
    # Deterministic init mimicking torch.nn.Linear U(-1/sqrt(fan_in), +1/sqrt(fan_in)).
    key = jax.random.PRNGKey(0)
    k1, k2, k3, k4 = jax.random.split(key, 4)
    bound1 = 1.0                      # fc1 fan_in = 1
    bound2 = 1.0 / jnp.sqrt(5.0)      # fc2 fan_in = 5
    w1 = jax.random.uniform(k1, (5, 1), jnp.float32, -bound1, bound1)
    b1 = jax.random.uniform(k2, (5,), jnp.float32, -bound1, bound1)
    w2 = jax.random.uniform(k3, (1, 5), jnp.float32, -bound2, bound2)
    b2 = jax.random.uniform(k4, (1,), jnp.float32, -bound2, bound2)
    return w1, b1, w2, b2


if __name__ == "__main__":
    w1, b1, w2, b2 = init_params()

    def ref_forward(xs):
        # Pure-JAX reference of the PyTorch forward: relu(x @ W1^T + b1) @ W2^T + b2.
        return jnp.maximum(xs @ w1.T + b1, 0.0) @ w2.T + b2

    # 1) The exact input tensor from the original script (N=20), forced through
    #    the Pallas kernel so the kernel path is exercised on the spec shape.
    x_spec = jnp.array(
        [[5.0], [10.0], [10.0], [5.0], [10.0], [5.0], [10.0], [10.0], [5.0],
         [10.0], [5.0], [10.0], [10.0], [5.0], [10.0], [5.0], [10.0], [10.0],
         [5.0], [10.0]],
        dtype=jnp.float32,
    )
    out_spec = jax.block_until_ready(
        net_forward(x_spec, w1, b1, w2, b2, force_pallas=True))
    assert out_spec.shape == (20, 1)
    assert jnp.allclose(out_spec, ref_forward(x_spec), atol=1e-5)

    # Small-N fast path (no kernel) must agree too.
    out_fast = jax.block_until_ready(net_forward(x_spec, w1, b1, w2, b2))
    assert jnp.allclose(out_fast, ref_forward(x_spec), atol=1e-5)

    # 2) N multiple of 128: zero-copy layout, 2 tiles (both v7x TCs busy).
    key = jax.random.PRNGKey(0)
    k1, k2 = jax.random.split(key)
    x_a = jax.random.uniform(k1, (131072, 1), jnp.float32, 0.0, 10.0)
    out_a = jax.block_until_ready(net_forward(x_a, w1, b1, w2, b2))
    assert jnp.allclose(out_a, ref_forward(x_a), atol=1e-4, rtol=1e-5)

    # 3) Awkward N: minimal tail pad + partial final grid block.
    x_b = jax.random.uniform(k2, (33000, 1), jnp.float32, -10.0, 10.0)
    out_b = jax.block_until_ready(net_forward(x_b, w1, b1, w2, b2))
    assert jnp.allclose(out_b, ref_forward(x_b), atol=1e-4, rtol=1e-5)

    print("KERNEL_OK")
</pallas_src>

<mosaic_0001>
module attributes {stable_mosaic.version = 11 : i64} {
  func.func @mlp_kernel(%arg0: i32, %arg1: memref<5xf32, #tpu.memory_space<smem>>, %arg2: memref<5xf32, #tpu.memory_space<smem>>, %arg3: memref<5xf32, #tpu.memory_space<smem>>, %arg4: memref<1xf32, #tpu.memory_space<smem>>, %arg5: memref<1x128xf32, #tpu.memory_space<vmem>>, %arg6: memref<1x128xf32, #tpu.memory_space<vmem>>) attributes {dimension_semantics = [#tpu.dimension_semantics<parallel>], iteration_bounds = array<i64: 1>, scalar_prefetch = 0 : i64, scratch_operands = 0 : i64, tpu.core_type = #tpu.core_type<tc>, window_params = [{transform_indices = @transform_0, window_bounds = array<i64: 5>}, {transform_indices = @transform_1, window_bounds = array<i64: 5>}, {transform_indices = @transform_2, window_bounds = array<i64: 5>}, {transform_indices = @transform_3, window_bounds = array<i64: 1>}, {transform_indices = @transform_4, window_bounds = array<i64: 1, 128>}, {transform_indices = @transform_5, window_bounds = array<i64: 1, 128>}]} {
    %c0 = arith.constant 0 : index
    %c0_0 = arith.constant 0 : index
    %0 = vector.load %arg5[%c0, %c0_0] : memref<1x128xf32, #tpu.memory_space<vmem>>, vector<1x128xf32>
    %c0_1 = arith.constant 0 : index
    %1 = memref.load %arg4[%c0_1] : memref<1xf32, #tpu.memory_space<smem>>
    %2 = vector.broadcast %1 : f32 to vector<1x128xf32>
    %c0_2 = arith.constant 0 : index
    %3 = memref.load %arg3[%c0_2] : memref<5xf32, #tpu.memory_space<smem>>
    %c0_3 = arith.constant 0 : index
    %4 = memref.load %arg1[%c0_3] : memref<5xf32, #tpu.memory_space<smem>>
    %5 = vector.broadcast %4 : f32 to vector<1x128xf32>
    %6 = arith.mulf %5, %0 : vector<1x128xf32>
    %c0_4 = arith.constant 0 : index
    %7 = memref.load %arg2[%c0_4] : memref<5xf32, #tpu.memory_space<smem>>
    %8 = vector.broadcast %7 : f32 to vector<1x128xf32>
    %9 = arith.addf %6, %8 : vector<1x128xf32>
    %cst = arith.constant 0.000000e+00 : f32
    %10 = vector.broadcast %cst : f32 to vector<1x128xf32>
    %11 = arith.maximumf %9, %10 : vector<1x128xf32>
    %12 = vector.broadcast %3 : f32 to vector<1x128xf32>
    %13 = arith.mulf %12, %11 : vector<1x128xf32>
    %14 = arith.addf %2, %13 : vector<1x128xf32>
    %c1 = arith.constant 1 : index
    %15 = memref.load %arg3[%c1] : memref<5xf32, #tpu.memory_space<smem>>
    %c1_5 = arith.constant 1 : index
    %16 = memref.load %arg1[%c1_5] : memref<5xf32, #tpu.memory_space<smem>>
    %17 = vector.broadcast %16 : f32 to vector<1x128xf32>
    %18 = arith.mulf %17, %0 : vector<1x128xf32>
    %c1_6 = arith.constant 1 : index
    %19 = memref.load %arg2[%c1_6] : memref<5xf32, #tpu.memory_space<smem>>
    %20 = vector.broadcast %19 : f32 to vector<1x128xf32>
    %21 = arith.addf %18, %20 : vector<1x128xf32>
    %cst_7 = arith.constant 0.000000e+00 : f32
    %22 = vector.broadcast %cst_7 : f32 to vector<1x128xf32>
    %23 = arith.maximumf %21, %22 : vector<1x128xf32>
    %24 = vector.broadcast %15 : f32 to vector<1x128xf32>
    %25 = arith.mulf %24, %23 : vector<1x128xf32>
    %26 = arith.addf %14, %25 : vector<1x128xf32>
    %c2 = arith.constant 2 : index
    %27 = memref.load %arg3[%c2] : memref<5xf32, #tpu.memory_space<smem>>
    %c2_8 = arith.constant 2 : index
    %28 = memref.load %arg1[%c2_8] : memref<5xf32, #tpu.memory_space<smem>>
    %29 = vector.broadcast %28 : f32 to vector<1x128xf32>
    %30 = arith.mulf %29, %0 : vector<1x128xf32>
    %c2_9 = arith.constant 2 : index
    %31 = memref.load %arg2[%c2_9] : memref<5xf32, #tpu.memory_space<smem>>
    %32 = vector.broadcast %31 : f32 to vector<1x128xf32>
    %33 = arith.addf %30, %32 : vector<1x128xf32>
    %cst_10 = arith.constant 0.000000e+00 : f32
    %34 = vector.broadcast %cst_10 : f32 to vector<1x128xf32>
    %35 = arith.maximumf %33, %34 : vector<1x128xf32>
    %36 = vector.broadcast %27 : f32 to vector<1x128xf32>
    %37 = arith.mulf %36, %35 : vector<1x128xf32>
    %38 = arith.addf %26, %37 : vector<1x128xf32>
    %c3 = arith.constant 3 : index
    %39 = memref.load %arg3[%c3] : memref<5xf32, #tpu.memory_space<smem>>
    %c3_11 = arith.constant 3 : index
    %40 = memref.load %arg1[%c3_11] : memref<5xf32, #tpu.memory_space<smem>>
    %41 = vector.broadcast %40 : f32 to vector<1x128xf32>
    %42 = arith.mulf %41, %0 : vector<1x128xf32>
    %c3_12 = arith.constant 3 : index
    %43 = memref.load %arg2[%c3_12] : memref<5xf32, #tpu.memory_space<smem>>
    %44 = vector.broadcast %43 : f32 to vector<1x128xf32>
    %45 = arith.addf %42, %44 : vector<1x128xf32>
    %cst_13 = arith.constant 0.000000e+00 : f32
    %46 = vector.broadcast %cst_13 : f32 to vector<1x128xf32>
    %47 = arith.maximumf %45, %46 : vector<1x128xf32>
    %48 = vector.broadcast %39 : f32 to vector<1x128xf32>
    %49 = arith.mulf %48, %47 : vector<1x128xf32>
    %50 = arith.addf %38, %49 : vector<1x128xf32>
    %c4 = arith.constant 4 : index
    %51 = memref.load %arg3[%c4] : memref<5xf32, #tpu.memory_space<smem>>
    %c4_14 = arith.constant 4 : index
    %52 = memref.load %arg1[%c4_14] : memref<5xf32, #tpu.memory_space<smem>>
    %53 = vector.broadcast %52 : f32 to vector<1x128xf32>
    %54 = arith.mulf %53, %0 : vector<1x128xf32>
    %c4_15 = arith.constant 4 : index
    %55 = memref.load %arg2[%c4_15] : memref<5xf32, #tpu.memory_space<smem>>
    %56 = vector.broadcast %55 : f32 to vector<1x128xf32>
    %57 = arith.addf %54, %56 : vector<1x128xf32>
    %cst_16 = arith.constant 0.000000e+00 : f32
    %58 = vector.broadcast %cst_16 : f32 to vector<1x128xf32>
    %59 = arith.maximumf %57, %58 : vector<1x128xf32>
    %60 = vector.broadcast %51 : f32 to vector<1x128xf32>
    %61 = arith.mulf %60, %59 : vector<1x128xf32>
    %62 = arith.addf %50, %61 : vector<1x128xf32>
    %c0_17 = arith.constant 0 : index
    %c0_18 = arith.constant 0 : index
    %63 = vector.load %arg6[%c0_17, %c0_18] : memref<1x128xf32, #tpu.memory_space<vmem>>, vector<1x128xf32>
    tpu.vector_store %arg6[%c0_17, %c0_18], %62 {strides = array<i32>} : memref<1x128xf32, #tpu.memory_space<vmem>>, vector<1x128xf32>,
    return
  }
  func.func @transform_0(%arg0: i32) -> i32 {
    %c0_i32 = arith.constant 0 : i32
    %c0_i32_0 = arith.constant 0 : i32
    return %c0_i32 : i32
  }
  func.func @transform_1(%arg0: i32) -> i32 {
    %c0_i32 = arith.constant 0 : i32
    %c0_i32_0 = arith.constant 0 : i32
    return %c0_i32 : i32
  }
  func.func @transform_2(%arg0: i32) -> i32 {
    %c0_i32 = arith.constant 0 : i32
    %c0_i32_0 = arith.constant 0 : i32
    return %c0_i32 : i32
  }
  func.func @transform_3(%arg0: i32) -> i32 {
    %c0_i32 = arith.constant 0 : i32
    %c0_i32_0 = arith.constant 0 : i32
    return %c0_i32 : i32
  }
  func.func @transform_4(%arg0: i32) -> (i32, i32) {
    %c0_i32 = arith.constant 0 : i32
    %c0_i32_0 = arith.constant 0 : i32
    return %arg0, %c0_i32 : i32, i32
  }
  func.func @transform_5(%arg0: i32) -> (i32, i32) {
    %c0_i32 = arith.constant 0 : i32
    %c0_i32_0 = arith.constant 0 : i32
    return %arg0, %c0_i32 : i32, i32
  }
}

</mosaic_0001>

<bundles_post_ra>
// kernel: tpu_custom_call.1
= control target key start
LH: loop header
LB: loop body
LE: loop exit
PB: predicated region body
PF: predicated region fallthrough
CT: control target
= control target key end

     0   :  { %11 = vsyncpa [#allocation5], 0  ;;  %s292_s0 = inlined_call_operand.vmem [shape: f32[5], index: 0, kind: input, shape index: {}]   ;;  %s293_s1 = inlined_call_operand.vmem [shape: f32[5], index: 1, kind: input, shape index: {}]   ;;  %s294_s2 = inlined_call_operand.vmem [shape: f32[5], index: 2, kind: input, shape index: {}]   ;;  %s295_s3 = inlined_call_operand.<no memory space> [shape: f32[1], index: 3, kind: input, shape index: {}]   ;;  %s296_s4 = inlined_call_operand.vmem [shape: f32[1,128], index: 4, kind: input, shape index: {}]   ;;  %s297_s5 = inlined_call_operand.hbm [shape: f32[1,128], index: 5, kind: output, shape index: {}]  }
   0x1   :  { %12 = vsyncpa [#allocation7], 0  ;;  %s30_s20 = sshll.u32 %s293_s1, 4  ;;  %s31_s20 = int_to_ptr.vmem [resolvable:$true] %s30_s20 }
   0x2   :  { %13 = vsyncpa [#allocation4], 0  ;;  %s20_s23 = sshll.u32 %s292_s0, 4  ;;  %s149_s24 = scalar_lea.vmem %s31_s20, 16  ;;  %s21_s23 = int_to_ptr.vmem [resolvable:$true] %s20_s23 }
   0x3   :  { %p150_p0 = scmp.ne.s32.totalorder %s31_s20, %s149_s24  ;;  %p154_p1 = scmp.lt.s32.totalorder %s31_s20, %s31_s20 }
   0x4   :  { %p155_p2 = scmp.lt.s32.totalorder %s149_s24, %s149_s24 }
   0x6   :  { %p156_p3 = por %p155_p2, %p154_p1 }
   0x8   :  { %p157_p4 = pnand %p156_p3, %p150_p0 }
   0xa   :  { %160 = shalt.err (!%p157_p4)
}
   0xb   :  { %s213_s25 = smov [#allocation6]   ;;  %s161_s26 = scalar_lea.vmem %s21_s23, 16 }
   0xc   :  { %33 = dma.vmem_to_smem %s31_s20, 16, %s213_s25, [#allocation7]  }
   0xd   :  { %p162_p5 = scmp.ne.s32.totalorder %s21_s23, %s161_s26  ;;  %p166_p6 = scmp.lt.s32.totalorder %s21_s23, %s21_s23 }
   0xe   :  { %p167_p7 = scmp.lt.s32.totalorder %s161_s26, %s161_s26 }
  0x10   :  { %p168_p8 = por %p167_p7, %p166_p6 }
  0x12   :  { %p169_p9 = pnand %p168_p8, %p162_p5 }
  0x14   :  { %172 = shalt.err (!%p169_p9)
}
  0x15   :  { %s214_s1 = smov [#allocation3]   ;;  %s40_s28 = sshll.u32 %s294_s2, 4  ;;  %s41_s28 = int_to_ptr.vmem [resolvable:$true] %s40_s28 }
  0x16   :  { %23 = dma.vmem_to_smem %s21_s23, 16, %s214_s1, [#allocation5]  }
  0x17   :  { %s173_s29 = scalar_lea.vmem %s41_s28, 16  ;;  %p178_p11 = scmp.lt.s32.totalorder %s41_s28, %s41_s28 }
  0x18   :  { %p174_p10 = scmp.ne.s32.totalorder %s41_s28, %s173_s29  ;;  %p179_p12 = scmp.lt.s32.totalorder %s173_s29, %s173_s29 }
  0x1a   :  { %p180_p13 = por %p179_p12, %p178_p11 }
  0x1c   :  { %p181_p0 = pnand %p180_p13, %p174_p10 }
  0x1e   :  { %184 = shalt.err (!%p181_p0)
}
  0x1f   :  { %s215_s30 = smov [#allocation8]  }
  0x20   :  { %43 = dma.vmem_to_smem %s41_s28, 16, %s215_s30, [#allocation7]  }
  0x21   :  { %207 = dma.done.wait [#allocation5], 16  }
  0x22   :  { %208 = vsyncadd [#allocation5], 4294967280 }
  0x23   :  { %209 = dma.done.wait [#allocation7], 32  }
  0x24   :  { %210 = vsyncadd [#allocation7], 4294967264 }
  0x25   :  { %57 = sfence }
  0x26   :  { %s256_s6 = sld [smem:[#allocation8]]  ;;  %s258_s2 = sld [smem:[#allocation8 + $0x1]]  ;;  %v58_v0 = vld [vmem:[%s296_s4] sm:$0x1]  ;;  %v60_v6 = vstv %s295_s3 }
  0x27   :  { %s62_s7 = sld [smem:[#allocation3]]  ;;  %s134_s9 = sld [smem:[#allocation3 + $0x1]] }
  0x28   :  { %s65_s8 = sld [smem:[#allocation6]]  ;;  %s135_s10 = sld [smem:[#allocation6 + $0x1]] }
  0x29   :  { %s137_s11 = sld [smem:[#allocation3 + $0x2]]  ;;  %s140_s16 = sld [smem:[#allocation3 + $0x3]] }
  0x2a   :  { %s263_s14 = sld [smem:[#allocation8 + $0x2]]  ;;  %s265_s17 = sld [smem:[#allocation6 + $0x3]] }
  0x2b   :  { %s138_s15 = sld [smem:[#allocation6 + $0x2]]  ;;  %s143_s18 = sld [smem:[#allocation3 + $0x4]] }
  0x2c   :  { %s267_s19 = sld [smem:[#allocation8 + $0x3]]  ;;  %s144_s20 = sld [smem:[#allocation6 + $0x4]]  ;;  %v69_v10 = vstv %s256_s6  ;;  %v80_v11 = vstv %s258_s2 }
  0x2d   :  { %v63_v1 = vstv %s62_s7  ;;  %v74_v4 = vstv %s134_s9  ;;  %s269_s4 = sld [smem:[#allocation8 + $0x4]]  ;;  %s216_s3 = smov [#allocation9]  }
  0x2e   :  { %v64_v2 = vmul.f32 %v63_v1, %v58_v0  ;;  %v66_v3 = vstv %s65_s8  ;;  %v77_v5 = vstv %s135_s10  ;;  %v75_v8 = vmul.f32 %v74_v4, %v58_v0  ;;  %s123_s23 = sshll.u32 %s216_s3, 4  ;;  %s124_s23 = int_to_ptr.vmem [resolvable:$true] %s123_s23 }
  0x2f   :  { %v85_v9 = vstv %s137_s11  ;;  %v96_v16 = vstv %s140_s16  ;;  %s185_s24 = scalar_lea.vmem %s124_s23, 16  ;;  %s189_s25 = scalar_lea.vmem %s124_s23, 32 }
  0x30   :  { %v67_v7 = vadd.f32 %v66_v3, %v64_v2  ;;  %v86_v12 = vmul.f32 %v85_v9, %v58_v0  ;;  %v78_v15 = vadd.f32 %v77_v5, %v75_v8  ;;  %v99_v17 = vstv %s265_s17  ;;  %p186_p1 = scmp.ne.s32.totalorder %s124_s23, %s185_s24  ;;  %p190_p2 = scmp.lt.s32.totalorder %s124_s23, %s124_s23 }
  0x31   :  { %v88_v13 = vstv %s138_s15  ;;  %v91_v19 = vstv %s263_s14  ;;  %v97_v20 = vmul.f32 %v96_v16, %v58_v0  ;;  %v107_v21 = vstv %s143_s18  ;;  %p191_p3 = scmp.lt.s32.totalorder %s189_s25, %s185_s24 }
  0x32   :  { %v68_v14 = vmax.f32 %v67_v7, 0.0  ;;  %v89_v18 = vadd.f32 %v88_v13, %v86_v12  ;;  %v79_v23 = vmax.f32 %v78_v15, 0.0  ;;  %v108_v24 = vmul.f32 %v107_v21, %v58_v0 }
  0x33   :  { %v110_v25 = vstv %s144_s20  ;;  %v100_v27 = vadd.f32 %v99_v17, %v97_v20  ;;  %v102_v30 = vstv %s267_s19  ;;  %v113_v34 = vstv %s269_s4  ;;  %p192_p4 = por %p191_p3, %p190_p2 }
  0x34   :  { %v70_v22 = vmul.f32 %v69_v10, %v68_v14  ;;  %v90_v26 = vmax.f32 %v89_v18, 0.0  ;;  %v81_v29 = vmul.f32 %v80_v11, %v79_v23  ;;  %v111_v31 = vadd.f32 %v110_v25, %v108_v24 }
  0x35   :  { %v101_v33 = vmax.f32 %v100_v27, 0.0  ;;  %p193_p5 = pnand %p192_p4, %p186_p1 }
  0x36   :  { %v71_v28 = vadd.f32 %v70_v22, %v60_v6  ;;  %v92_v32 = vmul.f32 %v91_v19, %v90_v26  ;;  %v112_v36 = vmax.f32 %v111_v31, 0.0 }
  0x37   :  { %v103_v37 = vmul.f32 %v102_v30, %v101_v33 }
  0x38   :  { %v82_v35 = vadd.f32 %v81_v29, %v71_v28  ;;  %v114_v39 = vmul.f32 %v113_v34, %v112_v36 }
  0x3a   :  { %v93_v38 = vadd.f32 %v92_v32, %v82_v35 }
  0x3c   :  { %v104_v40 = vadd.f32 %v103_v37, %v93_v38 }
  0x3e   :  { %v115_v41 = vadd.f32 %v114_v39, %v104_v40 }
  0x40   :  { %116 = vst [vmem:[#allocation9] sm:$0x1] %v115_v41 }
  0x41   :  { %196 = shalt.err (!%p193_p5)
}
  0x42   :  { %s197_s0 = scalar_lea.hbm %s297_s5, 16 }
  0x43   :  { %p198_p6 = scmp.ne.s32.totalorder %s297_s5, %s197_s0  ;;  %p201_p7 = scmp.lt.u32.totalorder %s197_s0, %s297_s5 }
  0x45   :  { %p203_p8 = pnand %p201_p7, %p198_p6 }
  0x47   :  { %206 = shalt.err (!%p203_p8)
}
  0x48   :  { %126 = dma.vmem_to_hbm [thread:$0]  %s124_s23, 16, %s297_s5, [#allocation4]  }
  0x49   :  { %211 = dma.done.wait [#allocation4], 16  }
  0x4a   :  { %212 = vsyncadd [#allocation4], 4294967280 }
  0x4b   :  { %130 = vsyncpa [#allocation4], 1 }
  0x4c   :  { %131 = vsyncpa [#allocation5], 1 }
  0x4d   :  { %132 = vsyncpa [#allocation7], 1 }

</bundles_post_ra>
